<compile_context>
chip_gen: v5e
topology: v5e:2x2
jax: 0.10.0
libtpu: 0.0.40
codegen_flags: <defaults>
</compile_context>

<pallas_src>
import jax
import jax.numpy as jnp
from jax.experimental import pallas as pl
from jax.experimental.pallas import tpu as pltpu


# ------------------------------- kernel ------------------------------------


def _linear_kernel(x_ref, wt_ref, b_ref, o_ref):
    # x_ref : (TILE_M, K)      row tile of the flattened input
    # wt_ref: (K, C_pad)       pre-transposed, class-padded weight (grid-resident)
    # b_ref : (1, C_pad)       zero-padded bias row                (grid-resident)
    # o_ref : (TILE_M, C_pad)  lane-dense output tile
    acc = jnp.dot(x_ref[...], wt_ref[...], preferred_element_type=jnp.float32)
    o_ref[...] = (acc + b_ref[...]).astype(o_ref.dtype)


# ------------------------------- helpers ------------------------------------

_LANE = 128
# Conservative double-buffered working-set budget: fits v7x's 64 MiB physical
# VMEM with headroom; comfortably inside v5e/v6e's 128 MiB.
_VMEM_BUDGET_BYTES = 40 * 1024 * 1024
# Raise the scoped-VMEM cap above the 16 MiB (v5e) / 32 MiB (v6e, v7x) defaults
# so the larger row tiles actually compile; still below every chip's physical.
_VMEM_LIMIT_BYTES = 48 * 1024 * 1024
# Only force >=2 row tiles (for v7x's two TensorCores) when there is enough
# work per tile to amortize the per-step pipeline overhead.
_SPLIT_MIN_ROWS = 512


def _round_up(x, m):
    return (x + m - 1) // m * m


def _sublane(dtype):
    # Sublane packing: f32 -> 8, bf16 -> 16, int8/fp8 -> 32.
    return {4: 8, 2: 16, 1: 32}.get(jnp.dtype(dtype).itemsize, 8)


def _choose_tile_m(M, ft_in, c_pad, itemsize, sublane, max_tile_m):
    # VMEM model (conservative: assume W.T/bias end up double-buffered too):
    #   2 * tile_m * ft_in   (input, double-buffered)
    # + 2 * tile_m * c_pad   (output, double-buffered)
    # + 2 * (ft_in*c_pad + c_pad)   (weight + bias)
    per_row = 2 * itemsize * (ft_in + c_pad)
    fixed = 2 * itemsize * (ft_in * c_pad + c_pad)
    avail = max(_VMEM_BUDGET_BYTES - fixed, per_row * sublane)
    tile_m = avail // per_row
    tile_m = min(tile_m, max_tile_m)
    tile_m = max(sublane, (tile_m // sublane) * sublane)   # sublane multiple
    tile_m = min(tile_m, _round_up(M, sublane))            # don't exceed problem
    # v7x has 2 TensorCores: keep >=2 row tiles when M is large enough so the
    # "parallel" grid axis can shard across both cores (neutral on v5e/v6e).
    if M >= _SPLIT_MIN_ROWS and tile_m >= M:
        tile_m = _round_up(pl.cdiv(M, 2), sublane)
    return tile_m


# ---------------------------- parameter prep --------------------------------


def prepare_logreg_params(weight, bias):
    """One-time parameter prep (hoisted out of the hot path).

    * Transpose the PyTorch-layout weight (C, K) -> (K, C) so the kernel does a
      single no-transpose MXU matmul per tile.
    * Zero-pad the class dim up to a multiple of 128 so output stores are
      lane-dense (unmasked vst) and the MXU sees a clean N=128 result tile.
    """
    nb_classes, ft_in = weight.shape
    c_pad = _round_up(nb_classes, _LANE)
    w_t = weight.T                                  # (ft_in, nb_classes)
    b_row = bias.reshape(1, nb_classes)             # (1, nb_classes)
    if c_pad != nb_classes:
        w_t = jnp.pad(w_t, ((0, 0), (0, c_pad - nb_classes)))
        b_row = jnp.pad(b_row, ((0, 0), (0, c_pad - nb_classes)))
    return w_t, b_row


# ------------------------------- forward ------------------------------------


def logreg_apply(seq, w_t, b_row, nb_classes, *, max_tile_m=1024):
    """Hot path: takes params already prepared by `prepare_logreg_params`."""
    lead_shape = seq.shape[:-1]
    ft_in, c_pad = w_t.shape
    assert seq.shape[-1] == ft_in

    x = seq.reshape(-1, ft_in)          # collapse leading dims (no data copy)
    M = x.shape[0]

    itemsize = jnp.dtype(seq.dtype).itemsize
    sublane = _sublane(seq.dtype)
    tile_m = _choose_tile_m(M, ft_in, c_pad, itemsize, sublane, max_tile_m)
    grid_m = pl.cdiv(M, tile_m)         # ragged tail masked by Pallas (no pad)

    def build_call(single_buffer_consts):
        def const_spec(shape):
            # W.T / bias have a constant index_map -> grid-resident; request a
            # single buffer to save VMEM when the pipeline mode is supported.
            if single_buffer_consts:
                return pl.BlockSpec(shape, lambda i: (0,) * len(shape),
                                    pipeline_mode=pl.Buffered(1))
            return pl.BlockSpec(shape, lambda i: (0,) * len(shape))

        grid_spec = pltpu.PrefetchScalarGridSpec(
            num_scalar_prefetch=0,
            grid=(grid_m,),
            in_specs=[
                pl.BlockSpec((tile_m, ft_in), lambda i: (i, 0)),
                const_spec((ft_in, c_pad)),
                const_spec((1, c_pad)),
            ],
            out_specs=pl.BlockSpec((tile_m, c_pad), lambda i: (i, 0)),
        )
        return pl.pallas_call(
            _linear_kernel,
            out_shape=jax.ShapeDtypeStruct((M, c_pad), seq.dtype),
            grid_spec=grid_spec,
            compiler_params=pltpu.CompilerParams(
                dimension_semantics=("parallel",),
                vmem_limit_bytes=_VMEM_LIMIT_BYTES,
            ),
        )

    try:
        out_padded = build_call(True)(x, w_t, b_row)
    except Exception:  # noqa: BLE001
        # pl.Buffered(1) on grid-resident operands is a pure VMEM optimisation;
        # if this jax/Mosaic version rejects it, the default double-buffered
        # specs are functionally identical (any real bug re-raises here).
        out_padded = build_call(False)(x, w_t, b_row)

    out = out_padded[:, :nb_classes] if c_pad != nb_classes else out_padded
    return out.reshape(*lead_shape, nb_classes)


def logreg_forward(seq, weight, bias, *, max_tile_m=1024):
    """LogReg forward: seq @ weight.T + bias (PyTorch nn.Linear semantics).

    seq:    (..., ft_in)
    weight: (nb_classes, ft_in)   (PyTorch nn.Linear layout)
    bias:   (nb_classes,)
    returns (..., nb_classes)
    """
    nb_classes, _ = weight.shape
    w_t, b_row = prepare_logreg_params(weight, bias)
    return logreg_apply(seq, w_t, b_row, nb_classes, max_tile_m=max_tile_m)


def init_logreg_params(key, ft_in, nb_classes):
    # nn.Linear(ft_in, nb_classes): weight (nb_classes, ft_in), bias (nb_classes,)
    # xavier_uniform_: bound = sqrt(6 / (fan_in + fan_out))
    bound = (6.0 / (ft_in + nb_classes)) ** 0.5
    weight = jax.random.uniform(key, (nb_classes, ft_in), jnp.float32,
                                minval=-bound, maxval=bound)
    bias = jnp.zeros((nb_classes,), jnp.float32)  # bias.fill_(0.0)
    return weight, bias


# --------------------------------- test -------------------------------------


if __name__ == "__main__":
    # Small shapes consistent with the module: batch=2, nodes=8, hidden=32,
    # nb_classes=7 (typical DGI downstream classifier head).
    B, N, ft_in, nb_classes = 2, 8, 32, 7

    key = jax.random.PRNGKey(0)
    k_w, k_x, k_y = jax.random.split(key, 3)

    weight, bias = init_logreg_params(k_w, ft_in, nb_classes)
    seq = jax.random.normal(k_x, (B, N, ft_in), jnp.float32)

    # Path 1: convenience wrapper (param prep + kernel).
    out = logreg_forward(seq, weight, bias)
    jax.block_until_ready(out)
    ref = jnp.einsum("...k,ck->...c", seq, weight) + bias
    assert out.shape == (B, N, nb_classes)
    assert jnp.allclose(out, ref, atol=1e-5, rtol=1e-5), (
        float(jnp.max(jnp.abs(out - ref))))

    # Path 2: params prepared once (inference hot path) + a ragged, multi-tile
    # row count to exercise the pad-free cdiv grid and masked tail stores.
    w_t, b_row = prepare_logreg_params(weight, bias)
    M2 = 41                                    # not a multiple of 8 or 16
    seq2 = jax.random.normal(k_y, (M2, ft_in), jnp.float32)
    out2 = logreg_apply(seq2, w_t, b_row, nb_classes, max_tile_m=16)  # grid=3
    jax.block_until_ready(out2)
    ref2 = seq2 @ weight.T + bias
    assert out2.shape == (M2, nb_classes)
    assert jnp.allclose(out2, ref2, atol=1e-5, rtol=1e-5), (
        float(jnp.max(jnp.abs(out2 - ref2))))

    print("KERNEL_OK")
</pallas_src>

<mosaic_0001>
module attributes {stable_mosaic.version = 11 : i64} {
  func.func @_linear_kernel(%arg0: i32, %arg1: memref<16x32xf32, #tpu.memory_space<vmem>>, %arg2: memref<32x128xf32, #tpu.memory_space<vmem>>, %arg3: memref<1x128xf32, #tpu.memory_space<vmem>>, %arg4: memref<16x128xf32, #tpu.memory_space<vmem>>) attributes {dimension_semantics = [#tpu.dimension_semantics<parallel>], iteration_bounds = array<i64: 1>, scalar_prefetch = 0 : i64, scratch_operands = 0 : i64, tpu.core_type = #tpu.core_type<tc>, window_params = [{transform_indices = @transform_0, window_bounds = array<i64: 16, 32>}, {pipeline_mode = #tpu.pipeline_mode<synchronous>, transform_indices = @transform_1, window_bounds = array<i64: 32, 128>}, {pipeline_mode = #tpu.pipeline_mode<synchronous>, transform_indices = @transform_2, window_bounds = array<i64: 1, 128>}, {transform_indices = @transform_3, window_bounds = array<i64: 16, 128>}]} {
    %c0 = arith.constant 0 : index
    %c0_0 = arith.constant 0 : index
    %0 = vector.load %arg1[%c0, %c0_0] : memref<16x32xf32, #tpu.memory_space<vmem>>, vector<16x32xf32>
    %c0_1 = arith.constant 0 : index
    %c0_2 = arith.constant 0 : index
    %1 = vector.load %arg2[%c0_1, %c0_2] : memref<32x128xf32, #tpu.memory_space<vmem>>, vector<32x128xf32>
    %cst = arith.constant dense<0.000000e+00> : vector<16x128xf32>
    %2 = tpu.matmul %0, %1, %cst {dimension_numbers = #tpu.dot_dimension_numbers<[1], [0], [0], [1], [0, 0, 1, 1], [], []>} : vector<16x32xf32>, vector<32x128xf32>, vector<16x128xf32> -> vector<16x128xf32>
    %c0_3 = arith.constant 0 : index
    %c0_4 = arith.constant 0 : index
    %3 = vector.load %arg3[%c0_3, %c0_4] : memref<1x128xf32, #tpu.memory_space<vmem>>, vector<1x128xf32>
    %4 = vector.broadcast %3 : vector<1x128xf32> to vector<16x128xf32>
    %5 = arith.addf %2, %4 : vector<16x128xf32>
    %c0_5 = arith.constant 0 : index
    %c0_6 = arith.constant 0 : index
    %6 = vector.load %arg4[%c0_5, %c0_6] : memref<16x128xf32, #tpu.memory_space<vmem>>, vector<16x128xf32>
    tpu.vector_store %arg4[%c0_5, %c0_6], %5 {strides = array<i32>} : memref<16x128xf32, #tpu.memory_space<vmem>>, vector<16x128xf32>,
    return
  }
  func.func @transform_0(%arg0: i32) -> (i32, i32) {
    %c0_i32 = arith.constant 0 : i32
    %c0_i32_0 = arith.constant 0 : i32
    return %arg0, %c0_i32 : i32, i32
  }
  func.func @transform_1(%arg0: i32) -> (i32, i32) {
    %c0_i32 = arith.constant 0 : i32
    %c0_i32_0 = arith.constant 0 : i32
    %c0_i32_1 = arith.constant 0 : i32
    return %c0_i32, %c0_i32_0 : i32, i32
  }
  func.func @transform_2(%arg0: i32) -> (i32, i32) {
    %c0_i32 = arith.constant 0 : i32
    %c0_i32_0 = arith.constant 0 : i32
    %c0_i32_1 = arith.constant 0 : i32
    return %c0_i32, %c0_i32_0 : i32, i32
  }
  func.func @transform_3(%arg0: i32) -> (i32, i32) {
    %c0_i32 = arith.constant 0 : i32
    %c0_i32_0 = arith.constant 0 : i32
    return %arg0, %c0_i32 : i32, i32
  }
}

module attributes {stable_mosaic.version = 11 : i64} {
  func.func @_linear_kernel(%arg0: i32, %arg1: memref<16x32xf32, #tpu.memory_space<vmem>>, %arg2: memref<32x128xf32, #tpu.memory_space<vmem>>, %arg3: memref<1x128xf32, #tpu.memory_space<vmem>>, %arg4: memref<16x128xf32, #tpu.memory_space<vmem>>) attributes {dimension_semantics = [#tpu.dimension_semantics<parallel>], iteration_bounds = array<i64: 1>, scalar_prefetch = 0 : i64, scratch_operands = 0 : i64, tpu.core_type = #tpu.core_type<tc>, window_params = [{transform_indices = @transform_0, window_bounds = array<i64: 16, 32>}, {pipeline_mode = #tpu.pipeline_mode<synchronous>, transform_indices = @transform_1, window_bounds = array<i64: 32, 128>}, {pipeline_mode = #tpu.pipeline_mode<synchronous>, transform_indices = @transform_2, window_bounds = array<i64: 1, 128>}, {transform_indices = @transform_3, window_bounds = array<i64: 16, 128>}]} {
    %c0 = arith.constant 0 : index
    %c0_0 = arith.constant 0 : index
    %0 = vector.load %arg1[%c0, %c0_0] : memref<16x32xf32, #tpu.memory_space<vmem>>, vector<16x32xf32>
    %c0_1 = arith.constant 0 : index
    %c0_2 = arith.constant 0 : index
    %1 = vector.load %arg2[%c0_1, %c0_2] : memref<32x128xf32, #tpu.memory_space<vmem>>, vector<32x128xf32>
    %cst = arith.constant dense<0.000000e+00> : vector<16x128xf32>
    %2 = tpu.matmul %0, %1, %cst {dimension_numbers = #tpu.dot_dimension_numbers<[1], [0], [0], [1], [0, 0, 1, 1], [], []>} : vector<16x32xf32>, vector<32x128xf32>, vector<16x128xf32> -> vector<16x128xf32>
    %c0_3 = arith.constant 0 : index
    %c0_4 = arith.constant 0 : index
    %3 = vector.load %arg3[%c0_3, %c0_4] : memref<1x128xf32, #tpu.memory_space<vmem>>, vector<1x128xf32>
    %4 = vector.broadcast %3 : vector<1x128xf32> to vector<16x128xf32>
    %5 = arith.addf %2, %4 : vector<16x128xf32>
    %c0_5 = arith.constant 0 : index
    %c0_6 = arith.constant 0 : index
    %6 = vector.load %arg4[%c0_5, %c0_6] : memref<16x128xf32, #tpu.memory_space<vmem>>, vector<16x128xf32>
    tpu.vector_store %arg4[%c0_5, %c0_6], %5 {strides = array<i32>} : memref<16x128xf32, #tpu.memory_space<vmem>>, vector<16x128xf32>,
    return
  }
  func.func @transform_0(%arg0: i32) -> (i32, i32) {
    %c0_i32 = arith.constant 0 : i32
    %c0_i32_0 = arith.constant 0 : i32
    return %arg0, %c0_i32 : i32, i32
  }
  func.func @transform_1(%arg0: i32) -> (i32, i32) {
    %c0_i32 = arith.constant 0 : i32
    %c0_i32_0 = arith.constant 0 : i32
    %c0_i32_1 = arith.constant 0 : i32
    return %c0_i32, %c0_i32_0 : i32, i32
  }
  func.func @transform_2(%arg0: i32) -> (i32, i32) {
    %c0_i32 = arith.constant 0 : i32
    %c0_i32_0 = arith.constant 0 : i32
    %c0_i32_1 = arith.constant 0 : i32
    return %c0_i32, %c0_i32_0 : i32, i32
  }
  func.func @transform_3(%arg0: i32) -> (i32, i32) {
    %c0_i32 = arith.constant 0 : i32
    %c0_i32_0 = arith.constant 0 : i32
    return %arg0, %c0_i32 : i32, i32
  }
}

</mosaic_0001>

<bundles_post_ra>
// kernel: tpu_custom_call.1
= control target key start
LH: loop header
LB: loop body
LE: loop exit
PB: predicated region body
PF: predicated region fallthrough
CT: control target
= control target key end

     0   :  { %8 = vsyncpa [#allocation3], 0  ;;  %s245_s0 = inlined_call_operand.hbm [shape: f32[16,32], index: 0, kind: input, shape index: {}]   ;;  %s246_s1 = inlined_call_operand.hbm [shape: f32[32,128], index: 1, kind: input, shape index: {}]   ;;  %s247_s2 = inlined_call_operand.vmem [shape: f32[1,128], index: 2, kind: input, shape index: {}]   ;;  %s248_s3 = inlined_call_operand.hbm [shape: f32[16,128], index: 3, kind: output, shape index: {}]  }
   0x1   :  { %9 = vsyncpa [#allocation6], 0 }
   0x2   :  { %10 = vsyncpa [#allocation4], 0  ;;  %s15_s14 = sshll.u32 %s245_s0, 4  ;;  %s199_s15 = smov [#allocation2]   ;;  %s16_s14 = int_to_ptr.hbm [resolvable:$true] %s15_s14 }
   0x3   :  { %s17_s16 = sshll.u32 %s199_s15, 4  ;;  %s28_s19 = sshll.u32 %s246_s1, 4  ;;  %s18_s16 = int_to_ptr.vmem [resolvable:$true] %s17_s16  ;;  %s29_s19 = int_to_ptr.hbm [resolvable:$true] %s28_s19 }
   0x4   :  { %s200_s20 = smov 128   ;;  %s201_s21 = smov 8  }
   0x5   :  { %23 = dma.hbm_to_vmem [thread:$0]  %s16_s14, 256, %s18_s16, [#allocation3], %s200_s20, %s200_s20, %s201_s21  }
   0x6   :  { %s202_s22 = smov [#allocation5]  }
   0x7   :  { %s30_s23 = sshll.u32 %s202_s22, 4  ;;  %s31_s23 = int_to_ptr.vmem [resolvable:$true] %s30_s23 }
   0x8   :  { %36 = dma.hbm_to_vmem [thread:$0]  %s29_s19, 512, %s31_s23, [#allocation6], %s200_s20, %s200_s20, %s201_s21  }
   0x9   :  { %193 = dma.done.wait [#allocation3], 256  }
   0xa   :  { %194 = vsyncadd [#allocation3], 4294967040 }
   0xb   :  { %195 = dma.done.wait [#allocation6], 512  }
   0xc   :  { %196 = vsyncadd [#allocation6], 4294966784  ;;  %v52_v0 = vld [vmem:[#allocation5 + $0x18] sm:$0xff]  ;;  %v51_v1 = vld [vmem:[#allocation5 + $0x10] sm:$0xff]  ;;  %vm57_vm0 = vcmask 261120   ;;  %s203_s24 = smov [#allocation7]  }
   0xd   :  { %76 = vmatpush.msra.mxu0 %v52_v0  ;;  %111 = vmatpush.msra.mxu1 %v52_v0  ;;  %v50_v2 = vld [vmem:[#allocation5 + $0x8] sm:$0xff]  ;;  %v49_v3 = vld [vmem:[#allocation5] sm:$0xff]  ;;  %v47_v4 = vld [vmem:[#allocation2] sm:$0xff]  ;;  %s93_s25 = sshll.u32 %s203_s24, 4  ;;  %s95_s28 = sshll.u32 %s248_s3, 4  ;;  %s94_s25 = int_to_ptr.vmem [resolvable:$true] %s93_s25  ;;  %s96_s28 = int_to_ptr.hbm [resolvable:$true] %s95_s28 }
   0xe   :  { %v48_v5 = vld [vmem:[#allocation2 + $0x8] sm:$0xff]  ;;  %v120_v6 = vld [vmem:[%s247_s2] ss:$0 sm:$0xff] }
   0xf   :  { %77 = vmatpush.msra.mxu0 %v51_v1  ;;  %112 = vmatpush.msra.mxu1 %v51_v1 }
  0x11   :  { %78 = vmatpush.msra.mxu0 %v50_v2  ;;  %113 = vmatpush.msra.mxu1 %v50_v2 }
  0x13   :  { %79 = vmatpush.msra.mxu0 %v49_v3  ;;  %114 = vmatpush.msra.mxu1 %v49_v3 }
  0x14   :  { %109 = vmatmul.msk.f32.vlgmr.msra.gmra.mxu0 %vm57_vm0, %v47_v4  ;;  %110 = vmatmul.msk.f32.vlgmr.msra.gmra.mxu1 %vm57_vm0, %v48_v5 }
  0x91   :  { %v81_v7 = vpop.f32.mrf.mxu0  ;;  %v84_v8 = vpop.f32.mrf.mxu1 }
  0x92   :  { %v82_v9 = vadd.f32 %v120_v6, %v81_v7  ;;  %v85_v10 = vadd.f32 %v120_v6, %v84_v8 }
  0x94   :  { %87 = vst [vmem:[#allocation7] sm:$0xff] %v82_v9 }
  0x95   :  { %88 = vst [vmem:[#allocation7 + $0x8] sm:$0xff] %v85_v10 }
  0x96   :  { %101 = dma.vmem_to_hbm [thread:$0]  %s94_s25, 256, %s96_s28, [#allocation4], %s200_s20, %s200_s20, %s201_s21  }
  0x97   :  { %197 = dma.done.wait [#allocation4], 256  }
  0x98   :  { %198 = vsyncadd [#allocation4], 4294967040 }
  0x99   :  { %106 = vsyncpa [#allocation3], 1 }
  0x9a   :  { %107 = vsyncpa [#allocation6], 1 }
  0x9b   :  { %108 = vsyncpa [#allocation4], 1 }

// kernel: tpu_custom_call.1
= control target key start
LH: loop header
LB: loop body
LE: loop exit
PB: predicated region body
PF: predicated region fallthrough
CT: control target
= control target key end

     0   :  { %8 = vsyncpa [#allocation3], 0  ;;  %s245_s0 = inlined_call_operand.hbm [shape: f32[16,32], index: 0, kind: input, shape index: {}]   ;;  %s246_s1 = inlined_call_operand.hbm [shape: f32[32,128], index: 1, kind: input, shape index: {}]   ;;  %s247_s2 = inlined_call_operand.vmem [shape: f32[1,128], index: 2, kind: input, shape index: {}]   ;;  %s248_s3 = inlined_call_operand.hbm [shape: f32[16,128], index: 3, kind: output, shape index: {}]  }
   0x1   :  { %9 = vsyncpa [#allocation6], 0 }
   0x2   :  { %10 = vsyncpa [#allocation4], 0  ;;  %s15_s14 = sshll.u32 %s245_s0, 4  ;;  %s199_s15 = smov [#allocation2]   ;;  %s16_s14 = int_to_ptr.hbm [resolvable:$true] %s15_s14 }
   0x3   :  { %s17_s16 = sshll.u32 %s199_s15, 4  ;;  %s28_s19 = sshll.u32 %s246_s1, 4  ;;  %s18_s16 = int_to_ptr.vmem [resolvable:$true] %s17_s16  ;;  %s29_s19 = int_to_ptr.hbm [resolvable:$true] %s28_s19 }
   0x4   :  { %s200_s20 = smov 128   ;;  %s201_s21 = smov 8  }
   0x5   :  { %23 = dma.hbm_to_vmem [thread:$0]  %s16_s14, 256, %s18_s16, [#allocation3], %s200_s20, %s200_s20, %s201_s21  }
   0x6   :  { %s202_s22 = smov [#allocation5]  }
   0x7   :  { %s30_s23 = sshll.u32 %s202_s22, 4  ;;  %s31_s23 = int_to_ptr.vmem [resolvable:$true] %s30_s23 }
   0x8   :  { %36 = dma.hbm_to_vmem [thread:$0]  %s29_s19, 512, %s31_s23, [#allocation6], %s200_s20, %s200_s20, %s201_s21  }
   0x9   :  { %193 = dma.done.wait [#allocation3], 256  }
   0xa   :  { %194 = vsyncadd [#allocation3], 4294967040 }
   0xb   :  { %195 = dma.done.wait [#allocation6], 512  }
   0xc   :  { %196 = vsyncadd [#allocation6], 4294966784  ;;  %v52_v0 = vld [vmem:[#allocation5 + $0x18] sm:$0xff]  ;;  %v51_v1 = vld [vmem:[#allocation5 + $0x10] sm:$0xff]  ;;  %vm57_vm0 = vcmask 261120   ;;  %s203_s24 = smov [#allocation7]  }
   0xd   :  { %76 = vmatpush.msra.mxu0 %v52_v0  ;;  %111 = vmatpush.msra.mxu1 %v52_v0  ;;  %v50_v2 = vld [vmem:[#allocation5 + $0x8] sm:$0xff]  ;;  %v49_v3 = vld [vmem:[#allocation5] sm:$0xff]  ;;  %v47_v4 = vld [vmem:[#allocation2] sm:$0xff]  ;;  %s93_s25 = sshll.u32 %s203_s24, 4  ;;  %s95_s28 = sshll.u32 %s248_s3, 4  ;;  %s94_s25 = int_to_ptr.vmem [resolvable:$true] %s93_s25  ;;  %s96_s28 = int_to_ptr.hbm [resolvable:$true] %s95_s28 }
   0xe   :  { %v48_v5 = vld [vmem:[#allocation2 + $0x8] sm:$0xff]  ;;  %v120_v6 = vld [vmem:[%s247_s2] ss:$0 sm:$0xff] }
   0xf   :  { %77 = vmatpush.msra.mxu0 %v51_v1  ;;  %112 = vmatpush.msra.mxu1 %v51_v1 }
  0x11   :  { %78 = vmatpush.msra.mxu0 %v50_v2  ;;  %113 = vmatpush.msra.mxu1 %v50_v2 }
  0x13   :  { %79 = vmatpush.msra.mxu0 %v49_v3  ;;  %114 = vmatpush.msra.mxu1 %v49_v3 }
  0x14   :  { %109 = vmatmul.msk.f32.vlgmr.msra.gmra.mxu0 %vm57_vm0, %v47_v4  ;;  %110 = vmatmul.msk.f32.vlgmr.msra.gmra.mxu1 %vm57_vm0, %v48_v5 }
  0x91   :  { %v81_v7 = vpop.f32.mrf.mxu0  ;;  %v84_v8 = vpop.f32.mrf.mxu1 }
  0x92   :  { %v82_v9 = vadd.f32 %v120_v6, %v81_v7  ;;  %v85_v10 = vadd.f32 %v120_v6, %v84_v8 }
  0x94   :  { %87 = vst [vmem:[#allocation7] sm:$0xff] %v82_v9 }
  0x95   :  { %88 = vst [vmem:[#allocation7 + $0x8] sm:$0xff] %v85_v10 }
  0x96   :  { %101 = dma.vmem_to_hbm [thread:$0]  %s94_s25, 256, %s96_s28, [#allocation4], %s200_s20, %s200_s20, %s201_s21  }
  0x97   :  { %197 = dma.done.wait [#allocation4], 256  }
  0x98   :  { %198 = vsyncadd [#allocation4], 4294967040 }
  0x99   :  { %106 = vsyncpa [#allocation3], 1 }
  0x9a   :  { %107 = vsyncpa [#allocation6], 1 }
  0x9b   :  { %108 = vsyncpa [#allocation4], 1 }

</bundles_post_ra>
